<compile_context>
chip_gen: v5e
topology: v5e:2x2
jax: 0.10.0
libtpu: 0.0.40
codegen_flags: <defaults>
</compile_context>

<pallas_src>
import jax
import jax.numpy as jnp
from jax.experimental import pallas as pl
from jax.experimental.pallas import tpu as pltpu

_MiB = 1024 * 1024


def _ma_gating_kernel(x_ref, a_ref, b_ref, o_ref):
    # x_ref / o_ref: (TB, S, D) tile; a_ref / b_ref: (S, D), resident across grid.
    # exp on the EUP slot (hidden under the block DMA), FMA on the VPU,
    # implicit (TB, S, D) * (S, D) broadcast, cast at the store.
    xf = x_ref[...].astype(jnp.float32)
    gate = jnp.exp(a_ref[...].astype(jnp.float32))
    bias = b_ref[...].astype(jnp.float32)
    o_ref[...] = (xf * gate + bias).astype(o_ref.dtype)


def _tpu_budget():
    """Per-TensorCore VMEM bytes and whether the chip has >1 TensorCore."""
    vmem_bytes = 64 * _MiB   # conservative default: v7x per-TC VMEM
    multi_core = True        # conservative default: v7x (2 TCs / chip)
    try:
        info = pltpu.get_tpu_info()
        v = getattr(info, "vmem_capacity_bytes", None)
        if v:
            vmem_bytes = int(v)
        # 128 MiB-VMEM parts (v5e / v6e) are single-TensorCore chips.
        multi_core = vmem_bytes < 100 * _MiB
    except Exception:
        pass
    return vmem_bytes, multi_core


def ma_gating(x, a, b):
    """x: (B, S, D); a, b: (S, D). Returns x * exp(a) + b (broadcast over batch)."""
    B, S, D = x.shape
    assert a.shape == (S, D) and b.shape == (S, D)

    vmem_bytes, multi_core = _tpu_budget()

    x_item = jnp.dtype(x.dtype).itemsize
    per_batch_bytes = S * D * x_item
    params_bytes = S * D * (jnp.dtype(a.dtype).itemsize + jnp.dtype(b.dtype).itemsize)

    # VMEM ceiling: ~80% of per-TC VMEM on 64 MiB parts (v7x), up to ~96 MiB
    # on 128 MiB parts (v5e / v6e).
    vmem_cap = min(int(0.80 * vmem_bytes), 96 * _MiB)

    # Block-byte target: large enough to amortize the ~0.35 us/step overhead,
    # small enough that 4*block + 2*params + slack fits under the cap.
    slack = 1 * _MiB
    desired = 14 * _MiB if vmem_bytes >= 100 * _MiB else 10 * _MiB
    target_block_bytes = max(
        per_batch_bytes,
        min(desired, (vmem_cap - 2 * params_bytes - slack) // 4),
    )

    # Batch rows per grid step; no divisor-of-B constraint (cdiv handles the
    # ragged final block, only the leading dim is partial).
    tb = max(1, min(B, target_block_bytes // per_batch_bytes))

    # Megacore balance (multi-TC chips only): make the grid a multiple of 2
    # when there is enough work to split, without going below ~2 MiB blocks.
    min_block_bytes = 2 * _MiB
    if multi_core and B * per_batch_bytes > 2 * min_block_bytes:
        while (tb > 1 and pl.cdiv(B, tb) % 2 != 0
               and (tb - 1) * per_batch_bytes >= min_block_bytes):
            tb -= 1

    grid_b = pl.cdiv(B, tb)
    block_bytes = tb * per_batch_bytes

    # vmem_limit: the real footprint (never below it), floored at the 16 MiB
    # scoped default, capped per generation.
    vmem_needed = 4 * block_bytes + 2 * params_bytes + slack
    vmem_limit = int(min(max(vmem_needed, 16 * _MiB), max(vmem_cap, vmem_needed)))

    return pl.pallas_call(
        _ma_gating_kernel,
        out_shape=jax.ShapeDtypeStruct((B, S, D), x.dtype),
        grid_spec=pltpu.PrefetchScalarGridSpec(
            num_scalar_prefetch=0,
            grid=(grid_b,),
            in_specs=[
                pl.BlockSpec((tb, S, D), lambda i: (i, 0, 0)),  # x: tb batch rows / step
                pl.BlockSpec((S, D), lambda i: (0, 0)),         # a: resident across grid
                pl.BlockSpec((S, D), lambda i: (0, 0)),         # b: resident across grid
            ],
            out_specs=pl.BlockSpec((tb, S, D), lambda i: (i, 0, 0)),
        ),
        compiler_params=pltpu.CompilerParams(
            dimension_semantics=("parallel",),
            vmem_limit_bytes=vmem_limit,
        ),
    )(x, a, b)


if __name__ == "__main__":
    # Module-consistent shapes: seq=64 (fixed by the module), d_model=512.
    d_model = 512
    B, S, D = 4, 64, d_model

    key = jax.random.PRNGKey(0)
    x = jax.random.normal(key, (B, S, D), dtype=jnp.float32)

    # Deterministic parameter init, exactly as in MaGating.__init__:
    a = jnp.zeros((S, D), dtype=jnp.float32)
    b = jnp.ones((S, D), dtype=jnp.float32)

    out = jax.block_until_ready(ma_gating(x, a, b))

    # Pure-JAX reference check of forward semantics.
    ref = x * jnp.exp(a)[None] + b[None]
    assert out.shape == (B, S, D)
    assert out.dtype == x.dtype
    assert jnp.allclose(out, ref, atol=1e-6, rtol=1e-6)

    print("KERNEL_OK")
</pallas_src>

<mosaic_0001>
module attributes {stable_mosaic.version = 11 : i64} {
  func.func @_ma_gating_kernel(%arg0: i32, %arg1: memref<4x64x512xf32, #tpu.memory_space<vmem>>, %arg2: memref<64x512xf32, #tpu.memory_space<vmem>>, %arg3: memref<64x512xf32, #tpu.memory_space<vmem>>, %arg4: memref<4x64x512xf32, #tpu.memory_space<vmem>>) attributes {dimension_semantics = [#tpu.dimension_semantics<parallel>], iteration_bounds = array<i64: 1>, scalar_prefetch = 0 : i64, scratch_operands = 0 : i64, tpu.core_type = #tpu.core_type<tc>, window_params = [{transform_indices = @transform_0, window_bounds = array<i64: 4, 64, 512>}, {pipeline_mode = #tpu.pipeline_mode<synchronous>, transform_indices = @transform_1, window_bounds = array<i64: 64, 512>}, {pipeline_mode = #tpu.pipeline_mode<synchronous>, transform_indices = @transform_2, window_bounds = array<i64: 64, 512>}, {transform_indices = @transform_3, window_bounds = array<i64: 4, 64, 512>}]} {
    %c0 = arith.constant 0 : index
    %c0_0 = arith.constant 0 : index
    %c0_1 = arith.constant 0 : index
    %0 = vector.load %arg1[%c0, %c0_0, %c0_1] : memref<4x64x512xf32, #tpu.memory_space<vmem>>, vector<4x64x512xf32>
    %c0_2 = arith.constant 0 : index
    %c0_3 = arith.constant 0 : index
    %1 = vector.load %arg2[%c0_2, %c0_3] : memref<64x512xf32, #tpu.memory_space<vmem>>, vector<64x512xf32>
    %2 = math.exp %1 : vector<64x512xf32>
    %c0_4 = arith.constant 0 : index
    %c0_5 = arith.constant 0 : index
    %3 = vector.load %arg3[%c0_4, %c0_5] : memref<64x512xf32, #tpu.memory_space<vmem>>, vector<64x512xf32>
    %4 = vector.shape_cast %2 : vector<64x512xf32> to vector<1x64x512xf32>
    %5 = vector.broadcast %4 : vector<1x64x512xf32> to vector<4x64x512xf32>
    %6 = arith.mulf %0, %5 : vector<4x64x512xf32>
    %7 = vector.shape_cast %3 : vector<64x512xf32> to vector<1x64x512xf32>
    %8 = vector.broadcast %7 : vector<1x64x512xf32> to vector<4x64x512xf32>
    %9 = arith.addf %6, %8 : vector<4x64x512xf32>
    %c0_6 = arith.constant 0 : index
    %c0_7 = arith.constant 0 : index
    %c0_8 = arith.constant 0 : index
    %10 = vector.load %arg4[%c0_6, %c0_7, %c0_8] : memref<4x64x512xf32, #tpu.memory_space<vmem>>, vector<4x64x512xf32>
    tpu.vector_store %arg4[%c0_6, %c0_7, %c0_8], %9 {strides = array<i32>} : memref<4x64x512xf32, #tpu.memory_space<vmem>>, vector<4x64x512xf32>,
    return
  }
  func.func @transform_0(%arg0: i32) -> (i32, i32, i32) {
    %c0_i32 = arith.constant 0 : i32
    %c0_i32_0 = arith.constant 0 : i32
    %c0_i32_1 = arith.constant 0 : i32
    return %arg0, %c0_i32, %c0_i32_0 : i32, i32, i32
  }
  func.func @transform_1(%arg0: i32) -> (i32, i32) {
    %c0_i32 = arith.constant 0 : i32
    %c0_i32_0 = arith.constant 0 : i32
    %c0_i32_1 = arith.constant 0 : i32
    return %c0_i32, %c0_i32_0 : i32, i32
  }
  func.func @transform_2(%arg0: i32) -> (i32, i32) {
    %c0_i32 = arith.constant 0 : i32
    %c0_i32_0 = arith.constant 0 : i32
    %c0_i32_1 = arith.constant 0 : i32
    return %c0_i32, %c0_i32_0 : i32, i32
  }
  func.func @transform_3(%arg0: i32) -> (i32, i32, i32) {
    %c0_i32 = arith.constant 0 : i32
    %c0_i32_0 = arith.constant 0 : i32
    %c0_i32_1 = arith.constant 0 : i32
    return %arg0, %c0_i32, %c0_i32_0 : i32, i32, i32
  }
}

</mosaic_0001>

<bundles_post_ra>
// kernel: tpu_custom_call.1
= control target key start
LH: loop header
LB: loop body
LE: loop exit
PB: predicated region body
PF: predicated region fallthrough
CT: control target
= control target key end

     0   :  { %8 = vsyncpa [#allocation3], 0  ;;  %s1535_s0 = inlined_call_operand.hbm [shape: f32[4,64,512], index: 0, kind: input, shape index: {}]   ;;  %s1536_s1 = inlined_call_operand.hbm [shape: f32[64,512], index: 1, kind: input, shape index: {}]   ;;  %s1537_s2 = inlined_call_operand.hbm [shape: f32[64,512], index: 2, kind: input, shape index: {}]   ;;  %s1538_s3 = inlined_call_operand.hbm [shape: f32[4,64,512], index: 3, kind: output, shape index: {}]  }
   0x1   :  { %9 = vsyncpa [#allocation6], 0 }
   0x2   :  { %10 = vsyncpa [#allocation4], 0  ;;  %s28_s14 = sshll.u32 %s1536_s1, 4  ;;  %s894_s15 = smov [#allocation5]   ;;  %s29_s14 = int_to_ptr.hbm [resolvable:$true] %s28_s14 }
   0x3   :  { %s30_s16 = sshll.u32 %s894_s15, 4  ;;  %s15_s19 = sshll.u32 %s1535_s0, 4  ;;  %s31_s16 = int_to_ptr.vmem [resolvable:$true] %s30_s16  ;;  %s16_s19 = int_to_ptr.hbm [resolvable:$true] %s15_s19 }
   0x4   :  { %s895_s20 = smov 512   ;;  %s896_s21 = smov 32  }
   0x5   :  { %36 = dma.hbm_to_vmem [thread:$0]  %s29_s14, 4096, %s31_s16, [#allocation6], %s895_s20, %s895_s20, %s896_s21  }
   0x6   :  { %s897_s22 = smov [#allocation2]   ;;  %s41_s1 = sshll.u32 %s1537_s2, 4  ;;  %s42_s1 = int_to_ptr.hbm [resolvable:$true] %s41_s1 }
   0x7   :  { %s17_s23 = sshll.u32 %s897_s22, 4  ;;  %s898_s0 = smov [#allocation7]   ;;  %s18_s23 = int_to_ptr.vmem [resolvable:$true] %s17_s23 }
   0x8   :  { %23 = dma.hbm_to_vmem [thread:$0]  %s16_s19, 16384, %s18_s23, [#allocation3], %s895_s20, %s895_s20, %s896_s21  }
   0x9   :  { %s43_s26 = sshll.u32 %s898_s0, 4  ;;  %s44_s26 = int_to_ptr.vmem [resolvable:$true] %s43_s26 }
   0xa   :  { %49 = dma.hbm_to_vmem [thread:$0]  %s42_s1, 4096, %s44_s26, [#allocation6], %s895_s20, %s895_s20, %s896_s21  }
   0xb   :  { %888 = dma.done.wait [#allocation3], 16384  }
   0xc   :  { %889 = vsyncadd [#allocation3], 4294950912 }
   0xd   :  { %890 = dma.done.wait [#allocation6], 8192  }
   0xe   :  { %891 = vsyncadd [#allocation6], 4294959104  ;;  %v190_v0 = vld [vmem:[#allocation5] sm:$0xff]  ;;  %v191_v2 = vld [vmem:[#allocation5 + $0x8] sm:$0xff]  ;;  %s899_s2 = smov [#allocation8]   ;;  %s708_s30 = sshll.u32 %s1538_s3, 4  ;;  %s709_s30 = int_to_ptr.hbm [resolvable:$true] %s708_s30 }
   0xf   :  { %v222_v1 = vmul.f32 1.442695, %v190_v0  ;;  %v224_v3 = vmul.f32 1.442695, %v191_v2  ;;  %v192_v4 = vld [vmem:[#allocation5 + $0x10] sm:$0xff]  ;;  %v193_v6 = vld [vmem:[#allocation5 + $0x18] sm:$0xff] }
  0x10   :  { %v226_v5 = vmul.f32 1.442695, %v192_v4  ;;  %v228_v7 = vmul.f32 1.442695, %v193_v6  ;;  %v194_v8 = vld [vmem:[#allocation5 + $0x20] sm:$0xff]  ;;  %v195_v10 = vld [vmem:[#allocation5 + $0x28] sm:$0xff] }
  0x11   :  { %728 = vpow2.f32 %v222_v1  ;;  %v230_v9 = vmul.f32 1.442695, %v194_v8  ;;  %v232_v11 = vmul.f32 1.442695, %v195_v10  ;;  %v196_v12 = vld [vmem:[#allocation5 + $0x30] sm:$0xff]  ;;  %v62_v13 = vld [vmem:[#allocation2] sm:$0xff] }
  0x12   :  { %730 = vpow2.f32 %v224_v3  ;;  %v234_v14 = vmul.f32 1.442695, %v196_v12  ;;  %v197_v15 = vld [vmem:[#allocation5 + $0x38] sm:$0xff]  ;;  %v938_v16 = vld [vmem:[#allocation7] sm:$0xff]  ;;  %v63_v17 = vld [vmem:[#allocation2 + $0x8] sm:$0xff]  ;;  %s706_s27 = sshll.u32 %s899_s2, 4  ;;  %s707_s27 = int_to_ptr.vmem [resolvable:$true] %s706_s27 }
  0x13   :  { %732 = vpow2.f32 %v226_v5  ;;  %v236_v18 = vmul.f32 1.442695, %v197_v15  ;;  %v198_v19 = vld [vmem:[#allocation5 + $0x40] sm:$0xff]  ;;  %v942_v21 = vld [vmem:[#allocation7 + $0x8] sm:$0xff]  ;;  %v64_v22 = vld [vmem:[#allocation2 + $0x10] sm:$0xff] }
  0x14   :  { %734 = vpow2.f32 %v228_v7  ;;  %v238_v23 = vmul.f32 1.442695, %v198_v19  ;;  %v199_v24 = vld [vmem:[#allocation5 + $0x48] sm:$0xff]  ;;  %v947_v27 = vld [vmem:[#allocation7 + $0x10] sm:$0xff]  ;;  %v65_v28 = vld [vmem:[#allocation2 + $0x18] sm:$0xff] }
  0x15   :  { %736 = vpow2.f32 %v230_v9  ;;  %v240_v29 = vmul.f32 1.442695, %v199_v24  ;;  %v200_v30 = vld [vmem:[#allocation5 + $0x50] sm:$0xff]  ;;  %v952_v33 = vld [vmem:[#allocation7 + $0x18] sm:$0xff]  ;;  %v66_v34 = vld [vmem:[#allocation2 + $0x20] sm:$0xff] }
  0x16   :  { %738 = vpow2.f32 %v232_v11  ;;  %v242_v35 = vmul.f32 1.442695, %v200_v30  ;;  %v201_v36 = vld [vmem:[#allocation5 + $0x58] sm:$0xff]  ;;  %v958_v40 = vld [vmem:[#allocation7 + $0x20] sm:$0xff]  ;;  %v67_v41 = vld [vmem:[#allocation2 + $0x28] sm:$0xff] }
  0x17   :  { %v940_v20 = vpop.eup %728  ;;  %740 = vpow2.f32 %v234_v14  ;;  %v244_v42 = vmul.f32 1.442695, %v201_v36  ;;  %v202_v43 = vld [vmem:[#allocation5 + $0x60] sm:$0xff]  ;;  %v964_v47 = vld [vmem:[#allocation7 + $0x28] sm:$0xff]  ;;  %v68_v48 = vld [vmem:[#allocation2 + $0x30] sm:$0xff] }
  0x18   :  { %1627 = vst [vmem:[#allocation12_spill] sm:$0xff] %v940_v20  ;;  %v944_v25 = vpop.eup %730  ;;  %v318_v26 = vmul.f32 %v940_v20, %v62_v13  ;;  %742 = vpow2.f32 %v236_v18  ;;  %v246_v49 = vmul.f32 1.442695, %v202_v43  ;;  %v203_v50 = vld [vmem:[#allocation5 + $0x68] sm:$0xff]  ;;  %v970_v54 = vld [vmem:[#allocation7 + $0x30] sm:$0xff]  ;;  %v69_v55 = vld [vmem:[#allocation2 + $0x38] sm:$0xff] }
  0x19   :  { %v949_v31 = vpop.eup %732  ;;  %v319_v32 = vmul.f32 %v944_v25, %v63_v17  ;;  %744 = vpow2.f32 %v238_v23  ;;  %1629 = vst [vmem:[#allocation14_spill] sm:$0xff] %v970_v54  ;;  %v248_v56 = vmul.f32 1.442695, %v203_v50  ;;  %v204_v57 = vld [vmem:[#allocation5 + $0x70] sm:$0xff]  ;;  %v976_v61 = vld [vmem:[#allocation7 + $0x38] sm:$0xff]  ;;  %v70_v62 = vld [vmem:[#allocation2 + $0x40] sm:$0xff] }
  0x1a   :  { %1628 = vst [vmem:[#allocation13_spill] sm:$0xff] %v949_v31  ;;  %v954_v37 = vpop.eup %734  ;;  %v446_v38 = vadd.f32 %v318_v26, %v938_v16  ;;  %v320_v39 = vmul.f32 %v949_v31, %v64_v22  ;;  %746 = vpow2.f32 %v240_v29  ;;  %v250_v63 = vmul.f32 1.442695, %v204_v57  ;;  %v205_v0 = vld [vmem:[#allocation5 + $0x78] sm:$0xff]  ;;  %v982_v4 = vld [vmem:[#allocation7 + $0x40] sm:$0xff]  ;;  %v71_v5 = vld [vmem:[#allocation2 + $0x48] sm:$0xff] }
  0x1b   :  { %v960_v44 = vpop.eup %736  ;;  %v447_v45 = vadd.f32 %v319_v32, %v942_v21  ;;  %v321_v46 = vmul.f32 %v954_v37, %v65_v28  ;;  %748 = vpow2.f32 %v242_v35  ;;  %v252_v6 = vmul.f32 1.442695, %v205_v0  ;;  %v206_v7 = vld [vmem:[#allocation5 + $0x80] sm:$0xff]  ;;  %v988_v11 = vld [vmem:[#allocation7 + $0x48] sm:$0xff]  ;;  %v72_v12 = vld [vmem:[#allocation2 + $0x50] sm:$0xff] }
  0x1c   :  { %v966_v51 = vpop.eup %738  ;;  %574 = vst [vmem:[#allocation8] sm:$0xff] %v446_v38  ;;  %v448_v52 = vadd.f32 %v320_v39, %v947_v27  ;;  %v322_v53 = vmul.f32 %v960_v44, %v66_v34  ;;  %750 = vpow2.f32 %v244_v42  ;;  %v254_v13 = vmul.f32 1.442695, %v206_v7  ;;  %v207_v14 = vld [vmem:[#allocation5 + $0x88] sm:$0xff]  ;;  %v994_v19 = vld [vmem:[#allocation7 + $0x50] sm:$0xff]  ;;  %v73_v22 = vld [vmem:[#allocation2 + $0x58] sm:$0xff] }
  0x1d   :  { %v972_v58 = vpop.eup %740  ;;  %575 = vst [vmem:[#allocation8 + $0x8] sm:$0xff] %v447_v45  ;;  %v449_v59 = vadd.f32 %v321_v46, %v952_v33  ;;  %v323_v60 = vmul.f32 %v966_v51, %v67_v41  ;;  %752 = vpow2.f32 %v246_v49  ;;  %v256_v23 = vmul.f32 1.442695, %v207_v14  ;;  %v208_v24 = vld [vmem:[#allocation5 + $0x90] sm:$0xff]  ;;  %v1000_v30 = vld [vmem:[#allocation7 + $0x58] sm:$0xff]  ;;  %v74_v32 = vld [vmem:[#allocation2 + $0x60] sm:$0xff] }
  0x1e   :  { %v978_v1 = vpop.eup %742  ;;  %576 = vst [vmem:[#allocation8 + $0x10] sm:$0xff] %v448_v52  ;;  %v450_v2 = vadd.f32 %v322_v53, %v958_v40  ;;  %v324_v3 = vmul.f32 %v972_v58, %v68_v48  ;;  %754 = vpow2.f32 %v248_v56  ;;  %v258_v34 = vmul.f32 1.442695, %v208_v24  ;;  %v209_v35 = vld [vmem:[#allocation5 + $0x98] sm:$0xff]  ;;  %v1006_v41 = vld [vmem:[#allocation7 + $0x60] sm:$0xff]  ;;  %v75_v42 = vld [vmem:[#allocation2 + $0x68] sm:$0xff] }
  0x1f   :  { %v984_v8 = vpop.eup %744  ;;  %577 = vst [vmem:[#allocation8 + $0x18] sm:$0xff] %v449_v59  ;;  %v451_v9 = vadd.f32 %v323_v60, %v964_v47  ;;  %v325_v10 = vmul.f32 %v978_v1, %v69_v55  ;;  %756 = vpow2.f32 %v250_v63  ;;  %v260_v43 = vmul.f32 1.442695, %v209_v35  ;;  %v210_v45 = vld [vmem:[#allocation5 + $0xa0] sm:$0xff]  ;;  %v1012_v50 = vld [vmem:[#allocation7 + $0x68] sm:$0xff]  ;;  %v76_v52 = vld [vmem:[#allocation2 + $0x70] sm:$0xff] }
  0x20   :  { %1630 = vst [vmem:[#allocation15_spill] sm:$0xff] %v984_v8  ;;  %v990_v15 = vpop.eup %746  ;;  %v452_v17 = vadd.f32 %v324_v3, %v970_v54  ;;  %v326_v18 = vmul.f32 %v984_v8, %v70_v62  ;;  %758 = vpow2.f32 %v252_v6  ;;  %v262_v53 = vmul.f32 1.442695, %v210_v45  ;;  %v211_v55 = vld [vmem:[#allocation5 + $0xa8] sm:$0xff]  ;;  %v1018_v60 = vld [vmem:[#allocation7 + $0x70] sm:$0xff]  ;;  %v77_v62 = vld [vmem:[#allocation2 + $0x78] sm:$0xff] }
  0x21   :  { %578 = vst [vmem:[#allocation8 + $0x20] sm:$0xff] %v450_v2  ;;  %v996_v26 = vpop.eup %748  ;;  %v453_v28 = vadd.f32 %v325_v10, %v976_v61  ;;  %v327_v29 = vmul.f32 %v990_v15, %v71_v5  ;;  %760 = vpow2.f32 %v254_v13  ;;  %v264_v63 = vmul.f32 1.442695, %v211_v55  ;;  %v212_v0 = vld [vmem:[#allocation5 + $0xb0] sm:$0xff]  ;;  %v1024_v6 = vld [vmem:[#allocation7 + $0x78] sm:$0xff]  ;;  %v78_v7 = vld [vmem:[#allocation2 + $0x80] sm:$0xff] }
  0x22   :  { %579 = vst [vmem:[#allocation8 + $0x28] sm:$0xff] %v451_v9  ;;  %v1002_v36 = vpop.eup %750  ;;  %v454_v38 = vadd.f32 %v326_v18, %v982_v4  ;;  %v328_v39 = vmul.f32 %v996_v26, %v72_v12  ;;  %762 = vpow2.f32 %v256_v23  ;;  %v266_v9 = vmul.f32 1.442695, %v212_v0  ;;  %v213_v10 = vld [vmem:[#allocation5 + $0xb8] sm:$0xff]  ;;  %v79_v18 = vld [vmem:[#allocation2 + $0x88] sm:$0xff]  ;;  %v214_v23 = vld [vmem:[#allocation5 + $0xc0] sm:$0xff] }
  0x23   :  { %1631 = vst [vmem:[#allocation16_spill] sm:$0xff] %v1002_v36  ;;  %v1008_v46 = vpop.eup %752  ;;  %v455_v48 = vadd.f32 %v327_v29, %v988_v11  ;;  %v329_v49 = vmul.f32 %v1002_v36, %v73_v22  ;;  %764 = vpow2.f32 %v258_v34  ;;  %v268_v22 = vmul.f32 1.442695, %v213_v10  ;;  %v80_v34 = vld [vmem:[#allocation2 + $0x90] sm:$0xff]  ;;  %v217_v0 = vld [vmem:[#allocation5 + $0xd8] sm:$0xff]  ;;  %v83_v10 = vld [vmem:[#allocation2 + $0xa8] sm:$0xff] }
  0x24   :  { %580 = vst [vmem:[#allocation8 + $0x30] sm:$0xff] %v452_v17  ;;  %v1014_v56 = vpop.eup %754  ;;  %v456_v57 = vadd.f32 %v328_v39, %v994_v19  ;;  %v330_v59 = vmul.f32 %v1008_v46, %v74_v32  ;;  %766 = vpow2.f32 %v260_v43  ;;  %v1030_v17 = vld [vmem:[#allocation7 + $0x80] sm:$0xff]  ;;  %v1036_v32 = vld [vmem:[#allocation7 + $0x88] sm:$0xff]  ;;  %v270_v35 = vmul.f32 1.442695, %v214_v23  ;;  %v1042_v45 = vld [vmem:[#allocation7 + $0x90] sm:$0xff] }
  0x25   :  { %1632 = vst [vmem:[#allocation17_spill] sm:$0xff] %v1006_v41  ;;  %v1020_v2 = vpop.eup %756  ;;  %v457_v3 = vadd.f32 %v329_v49, %v1000_v30  ;;  %v331_v5 = vmul.f32 %v1014_v56, %v75_v42  ;;  %768 = vpow2.f32 %v262_v53 }
  0x26   :  { %581 = vst [vmem:[#allocation8 + $0x38] sm:$0xff] %v453_v28  ;;  %v1026_v12 = vpop.eup %758  ;;  %v458_v13 = vadd.f32 %v330_v59, %v1006_v41  ;;  %v332_v14 = vmul.f32 %v1020_v2, %v76_v52  ;;  %770 = vpow2.f32 %v264_v63  ;;  %v216_v52 = vld [vmem:[#allocation5 + $0xd0] sm:$0xff]  ;;  %v1048_v59 = vld [vmem:[#allocation7 + $0x98] sm:$0xff] }
  0x27   :  { %1633 = vst [vmem:[#allocation18_spill] sm:$0xff] %v1012_v50  ;;  %v1032_v24 = vpop.eup %760  ;;  %v459_v28 = vadd.f32 %v331_v5, %v1012_v50  ;;  %v333_v29 = vmul.f32 %v1026_v12, %v77_v62  ;;  %772 = vpow2.f32 %v266_v9  ;;  %v82_v62 = vld [vmem:[#allocation2 + $0xa0] sm:$0xff]  ;;  %v274_v63 = vmul.f32 1.442695, %v216_v52  ;;  %v85_v52 = vld [vmem:[#allocation2 + $0xb8] sm:$0xff] }
  0x28   :  { %582 = vst [vmem:[#allocation8 + $0x40] sm:$0xff] %v454_v38  ;;  %v215_v38 = vld [vmem:[#allocation5 + $0xc8] sm:$0xff]  ;;  %v1038_v39 = vpop.eup %762  ;;  %v460_v42 = vadd.f32 %v332_v14, %v1018_v60  ;;  %v334_v43 = vmul.f32 %v1032_v24, %v78_v7  ;;  %774 = vpow2.f32 %v268_v22  ;;  %v1054_v9 = vld [vmem:[#allocation7 + $0xa0] sm:$0xff] }
  0x29   :  { %1634 = vst [vmem:[#allocation19_spill] sm:$0xff] %v1018_v60  ;;  %v272_v49 = vmul.f32 1.442695, %v215_v38  ;;  %v1044_v53 = vpop.eup %764  ;;  %v461_v55 = vadd.f32 %v333_v29, %v1024_v6  ;;  %776 = vpow2.f32 %v270_v35  ;;  %v218_v14 = vld [vmem:[#allocation5 + $0xe0] sm:$0xff]  ;;  %v84_v29 = vld [vmem:[#allocation2 + $0xb0] sm:$0xff]  ;;  %v219_v38 = vld [vmem:[#allocation5 + $0xe8] sm:$0xff] }
  0x2a   :  { %1635 = vst [vmem:[#allocation20_spill] sm:$0xff] %v1020_v2  ;;  %v462_v5 = vadd.f32 %v334_v43, %v1030_v17  ;;  %v336_v7 = vmul.f32 %v1044_v53, %v80_v34  ;;  %v278_v35 = vmul.f32 1.442695, %v218_v14  ;;  %v1072_v14 = vld [vmem:[#allocation7 + $0xb8] sm:$0xff]  ;;  %v95_v60 = vld [vmem:[#allocation2 + $0x108] sm:$0xff] }
  0x2b   :  { %583 = vst [vmem:[#allocation8 + $0x48] sm:$0xff] %v455_v48  ;;  %v81_v48 = vld [vmem:[#allocation2 + $0x98] sm:$0xff]  ;;  %778 = vpow2.f32 %v272_v49  ;;  %v1066_v49 = vld [vmem:[#allocation7 + $0xb0] sm:$0xff] }
  0x2c   :  { %1636 = vst [vmem:[#allocation21_spill] sm:$0xff] %v1024_v6  ;;  %780 = vpow2.f32 %v274_v63  ;;  %v90_v6 = vld [vmem:[#allocation2 + $0xe0] sm:$0xff] }
  0x2d   :  { %1637 = vst [vmem:[#allocation22_spill] sm:$0xff] %v1026_v12 }
  0x2e   :  { %584 = vst [vmem:[#allocation8 + $0x50] sm:$0xff] %v456_v57  ;;  %v335_v57 = vmul.f32 %v1038_v39, %v79_v18 }
  0x2f   :  { %1638 = vst [vmem:[#allocation23_spill] sm:$0xff] %v1030_v17  ;;  %v1080_v17 = vld [vmem:[#allocation7 + $0xc8] sm:$0xff] }
  0x30   :  { %1639 = vst [vmem:[#allocation24_spill] sm:$0xff] %v1032_v24  ;;  %v463_v22 = vadd.f32 %v335_v57, %v1036_v32  ;;  %v220_v57 = vld [vmem:[#allocation5 + $0xf0] sm:$0xff] }
  0x31   :  { %585 = vst [vmem:[#allocation8 + $0x58] sm:$0xff] %v457_v3  ;;  %v1050_v3 = vpop.eup %766 }
  0x32   :  { %1640 = vst [vmem:[#allocation25_spill] sm:$0xff] %v1036_v32  ;;  %v1056_v18 = vpop.eup %768  ;;  %v337_v23 = vmul.f32 %v1050_v3, %v81_v48  ;;  %v1078_v32 = vld [vmem:[#allocation7 + $0xc0] sm:$0xff] }
  0x33   :  { %1641 = vst [vmem:[#allocation26_spill] sm:$0xff] %v1038_v39  ;;  %v1062_v34 = vpop.eup %770  ;;  %v338_v43 = vmul.f32 %v1056_v18, %v82_v62 }
  0x34   :  { %586 = vst [vmem:[#allocation8 + $0x60] sm:$0xff] %v458_v13  ;;  %v276_v13 = vmul.f32 1.442695, %v217_v0  ;;  %v1068_v48 = vpop.eup %772  ;;  %v465_v63 = vadd.f32 %v337_v23, %v1048_v59  ;;  %v339_v0 = vmul.f32 %v1062_v34, %v83_v10 }
  0x35   :  { %1642 = vst [vmem:[#allocation27_spill] sm:$0xff] %v1042_v45  ;;  %v1074_v62 = vpop.eup %774 }
  0x36   :  { %1643 = vst [vmem:[#allocation28_spill] sm:$0xff] %v1044_v53  ;;  %782 = vpow2.f32 %v276_v13  ;;  %v466_v13 = vadd.f32 %v338_v43, %v1054_v9  ;;  %v1082_v23 = vpop.eup %776  ;;  %v89_v43 = vld [vmem:[#allocation2 + $0xd8] sm:$0xff] }
  0x37   :  { %587 = vst [vmem:[#allocation8 + $0x68] sm:$0xff] %v459_v28  ;;  %v1060_v28 = vld [vmem:[#allocation7 + $0xa8] sm:$0xff]  ;;  %784 = vpow2.f32 %v278_v35 }
  0x38   :  { %1644 = vst [vmem:[#allocation29_spill] sm:$0xff] %v1048_v59  ;;  %v467_v35 = vadd.f32 %v339_v0, %v1060_v28  ;;  %v88_v59 = vld [vmem:[#allocation2 + $0xd0] sm:$0xff] }
  0x39   :  { %1645 = vst [vmem:[#allocation30_spill] sm:$0xff] %v1050_v3 }
  0x3a   :  { %588 = vst [vmem:[#allocation8 + $0x70] sm:$0xff] %v460_v42  ;;  %v464_v42 = vadd.f32 %v336_v7, %v1042_v45  ;;  %v282_v7 = vmul.f32 1.442695, %v220_v57  ;;  %v221_v45 = vld [vmem:[#allocation5 + $0xf8] sm:$0xff]  ;;  %v341_v57 = vmul.f32 %v1074_v62, %v85_v52 }
  0x3b   :  { %1646 = vst [vmem:[#allocation31_spill] sm:$0xff] %v1054_v9  ;;  %v284_v10 = vmul.f32 1.442695, %v221_v45  ;;  %v1092_v45 = vld [vmem:[#allocation7 + $0xd8] sm:$0xff] }
  0x3c   :  { %1647 = vst [vmem:[#allocation32_spill] sm:$0xff] %v1056_v18  ;;  %v469_v52 = vadd.f32 %v341_v57, %v1072_v14  ;;  %v92_v57 = vld [vmem:[#allocation2 + $0xf0] sm:$0xff] }
  0x3d   :  { %589 = vst [vmem:[#allocation8 + $0x78] sm:$0xff] %v461_v55  ;;  %v280_v55 = vmul.f32 1.442695, %v219_v38  ;;  %v340_v38 = vmul.f32 %v1068_v48, %v84_v29  ;;  %v1088_v29 = vpop.eup %778 }
  0x3e   :  { %1648 = vst [vmem:[#allocation33_spill] sm:$0xff] %v1060_v28  ;;  %v1094_v0 = vpop.eup %780 }
  0x3f   :  { %1649 = vst [vmem:[#allocation34_spill] sm:$0xff] %v1062_v34  ;;  %786 = vpow2.f32 %v280_v55  ;;  %v468_v9 = vadd.f32 %v340_v38, %v1066_v49  ;;  %v1100_v50 = vpop.eup %782  ;;  %v344_v38 = vmul.f32 %v1094_v0, %v88_v59 }
  0x40   :  { %590 = vst [vmem:[#allocation8 + $0x80] sm:$0xff] %v462_v5  ;;  %v86_v5 = vld [vmem:[#allocation2 + $0xc0] sm:$0xff]  ;;  %788 = vpow2.f32 %v282_v7  ;;  %v1104_v41 = vpop.eup %784 }
  0x41   :  { %1650 = vst [vmem:[#allocation35_spill] sm:$0xff] %v1066_v49  ;;  %v342_v55 = vmul.f32 %v1082_v23, %v86_v5  ;;  %790 = vpow2.f32 %v284_v10  ;;  %v1098_v7 = vld [vmem:[#allocation7 + $0xe0] sm:$0xff]  ;;  %v91_v10 = vld [vmem:[#allocation2 + $0xe8] sm:$0xff]  ;;  %v97_v49 = vld [vmem:[#allocation2 + $0x118] sm:$0xff] }
  0x42   :  { %1651 = vst [vmem:[#allocation36_spill] sm:$0xff] %v1068_v48 }
  0x43   :  { %591 = vst [vmem:[#allocation8 + $0x88] sm:$0xff] %v463_v22  ;;  %v87_v22 = vld [vmem:[#allocation2 + $0xc8] sm:$0xff]  ;;  %v470_v5 = vadd.f32 %v342_v55, %v1078_v32  ;;  %v346_v55 = vmul.f32 %v1104_v41, %v90_v6 }
  0x44   :  { %1652 = vst [vmem:[#allocation37_spill] sm:$0xff] %v1072_v14  ;;  %v343_v28 = vmul.f32 %v1088_v29, %v87_v22  ;;  %v345_v22 = vmul.f32 %v1100_v50, %v89_v43  ;;  %v99_v14 = vld [vmem:[#allocation2 + $0x128] sm:$0xff]  ;;  %v101_v43 = vld [vmem:[#allocation2 + $0x138] sm:$0xff] }
  0x45   :  { %1653 = vst [vmem:[#allocation38_spill] sm:$0xff] %v1074_v62  ;;  %v100_v62 = vld [vmem:[#allocation2 + $0x130] sm:$0xff] }
  0x46   :  { %592 = vst [vmem:[#allocation8 + $0x90] sm:$0xff] %v464_v42  ;;  %v1086_v42 = vld [vmem:[#allocation7 + $0xd0] sm:$0xff] }
  0x47   :  { %1654 = vst [vmem:[#allocation39_spill] sm:$0xff] %v1078_v32  ;;  %v472_v59 = vadd.f32 %v344_v38, %v1086_v42  ;;  %v1113_v32 = vld [vmem:[#allocation7 + $0xe8] sm:$0xff]  ;;  %v353_v38 = vmul.f32 %v954_v37, %v97_v49 }
  0x48   :  { %1655 = vst [vmem:[#allocation40_spill] sm:$0xff] %v1080_v17 }
  0x49   :  { %1656 = vst [vmem:[#allocation41_spill] sm:$0xff] %v1082_v23  ;;  %v98_v23 = vld [vmem:[#allocation2 + $0x120] sm:$0xff] }
  0x4a   :  { %593 = vst [vmem:[#allocation8 + $0x98] sm:$0xff] %v465_v63  ;;  %v94_v63 = vld [vmem:[#allocation2 + $0x100] sm:$0xff]  ;;  %v354_v6 = vmul.f32 %v960_v44, %v98_v23  ;;  %v357_v23 = vmul.f32 %v978_v1, %v101_v43  ;;  %v108_v43 = vld [vmem:[#allocation2 + $0x170] sm:$0xff] }
  0x4b   :  { %1657 = vst [vmem:[#allocation42_spill] sm:$0xff] %v1086_v42  ;;  %v102_v42 = vld [vmem:[#allocation2 + $0x140] sm:$0xff] }
  0x4c   :  { %1658 = vst [vmem:[#allocation43_spill] sm:$0xff] %v1088_v29  ;;  %v350_v29 = vmul.f32 %v940_v20, %v94_v63  ;;  %v473_v63 = vadd.f32 %v345_v22, %v1092_v45 }
  0x4d   :  { %594 = vst [vmem:[#allocation8 + $0xa0] sm:$0xff] %v466_v13  ;;  %v96_v13 = vld [vmem:[#allocation2 + $0x110] sm:$0xff] }
  0x4e   :  { %1659 = vst [vmem:[#allocation44_spill] sm:$0xff] %v1092_v45  ;;  %v103_v45 = vld [vmem:[#allocation2 + $0x148] sm:$0xff] }
  0x4f   :  { %1660 = vst [vmem:[#allocation45_spill] sm:$0xff] %v1094_v0  ;;  %v93_v0 = vld [vmem:[#allocation2 + $0xf8] sm:$0xff] }
  0x50   :  { %595 = vst [vmem:[#allocation8 + $0xa8] sm:$0xff] %v467_v35  ;;  %v471_v35 = vadd.f32 %v343_v28, %v1080_v17  ;;  %v352_v28 = vmul.f32 %v949_v31, %v96_v13  ;;  %v1129_v31 = vld [vmem:[#allocation7 + $0xf8] sm:$0xff] }
  0x51   :  { %1661 = vst [vmem:[#allocation46_spill] sm:$0xff] %v1098_v7 }
  0x52   :  { %1662 = vst [vmem:[#allocation47_spill] sm:$0xff] %v1100_v50 }
  0x53   :  { %596 = vst [vmem:[#allocation8 + $0xb0] sm:$0xff] %v468_v9  ;;  %v1109_v9 = vpop.eup %786 }
  0x54   :  { %1663 = vst [vmem:[#allocation48_spill] sm:$0xff] %v1104_v41  ;;  %v1117_v17 = vpop.eup %788  ;;  %v347_v50 = vmul.f32 %v1109_v9, %v91_v10  ;;  %v356_v10 = vmul.f32 %v972_v58, %v100_v62 }
  0x55   :  { %597 = vst [vmem:[#allocation8 + $0xb8] sm:$0xff] %v469_v52  ;;  %v351_v52 = vmul.f32 %v944_v25, %v95_v60  ;;  %v1125_v41 = vpop.eup %790  ;;  %v474_v60 = vadd.f32 %v346_v55, %v1098_v7  ;;  %v348_v13 = vmul.f32 %v1117_v17, %v92_v57  ;;  %v478_v57 = vadd.f32 %v350_v29, %v938_v16  ;;  %v105_v7 = vld [vmem:[#allocation2 + $0x158] sm:$0xff] }
  0x56   :  { %1664 = vst [vmem:[#allocation49_spill] sm:$0xff] %v1109_v9  ;;  %v475_v22 = vadd.f32 %v347_v50, %v1113_v32  ;;  %v349_v49 = vmul.f32 %v1125_v41, %v93_v0  ;;  %v104_v9 = vld [vmem:[#allocation2 + $0x150] sm:$0xff]  ;;  %v358_v55 = vmul.f32 %v984_v8, %v102_v42  ;;  %v480_v0 = vadd.f32 %v352_v28, %v947_v27 }
  0x57   :  { %598 = vst [vmem:[#allocation8 + $0xc0] sm:$0xff] %v470_v5  ;;  %v1121_v5 = vld [vmem:[#allocation7 + $0xf0] sm:$0xff]  ;;  %v479_v50 = vadd.f32 %v351_v52, %v942_v21  ;;  %v482_v29 = vadd.f32 %v354_v6, %v958_v40  ;;  %v485_v52 = vadd.f32 %v357_v23, %v976_v61  ;;  %v359_v28 = vmul.f32 %v990_v15, %v103_v45 }
  0x58   :  { %1665 = vst [vmem:[#allocation50_spill] sm:$0xff] %v1113_v32  ;;  %v477_v62 = vadd.f32 %v349_v49, %v1129_v31  ;;  %v110_v32 = vld [vmem:[#allocation2 + $0x180] sm:$0xff]  ;;  %v360_v49 = vmul.f32 %v996_v26, %v104_v9  ;;  %v116_v8 = vld [vmem:[#allocation2 + $0x1b0] sm:$0xff]  ;;  %v486_v6 = vadd.f32 %v358_v55, %v982_v4 }
  0x59   :  { %1666 = vst [vmem:[#allocation51_spill] sm:$0xff] %v1117_v17  ;;  %v107_v17 = vld [vmem:[#allocation2 + $0x168] sm:$0xff]  ;;  %v366_v9 = vmul.f32 %v1032_v24, %v110_v32 }
  0x5a   :  { %599 = vst [vmem:[#allocation8 + $0xc8] sm:$0xff] %v471_v35  ;;  %v355_v35 = vmul.f32 %v966_v51, %v99_v14  ;;  %v106_v14 = vld [vmem:[#allocation2 + $0x160] sm:$0xff] }
  0x5b   :  { %1667 = vst [vmem:[#allocation52_spill] sm:$0xff] %v1121_v5 }
  0x5c   :  { %1668 = vst [vmem:[#allocation53_spill] sm:$0xff] %v1125_v41  ;;  %v483_v42 = vadd.f32 %v355_v35, %v964_v47  ;;  %v113_v41 = vld [vmem:[#allocation2 + $0x198] sm:$0xff]  ;;  %v362_v35 = vmul.f32 %v1008_v46, %v106_v14  ;;  %v372_v14 = vmul.f32 %v1068_v48, %v116_v8  ;;  %v120_v48 = vld [vmem:[#allocation2 + $0x1d0] sm:$0xff] }
  0x5d   :  { %600 = vst [vmem:[#allocation8 + $0xd0] sm:$0xff] %v472_v59  ;;  %v476_v59 = vadd.f32 %v348_v13, %v1121_v5  ;;  %v484_v13 = vadd.f32 %v356_v10, %v970_v54  ;;  %v111_v5 = vld [vmem:[#allocation2 + $0x188] sm:$0xff]  ;;  %v363_v10 = vmul.f32 %v1014_v56, %v107_v17  ;;  %v117_v54 = vld [vmem:[#allocation2 + $0x1b8] sm:$0xff] }
  0x5e   :  { %1669 = vst [vmem:[#allocation54_spill] sm:$0xff] %v1129_v31  ;;  %v114_v31 = vld [vmem:[#allocation2 + $0x1a0] sm:$0xff] }
  0x5f   :  { %601 = vst [vmem:[#allocation8 + $0xd8] sm:$0xff] %v473_v63  ;;  %v109_v63 = vld [vmem:[#allocation2 + $0x178] sm:$0xff]  ;;  %v370_v55 = vmul.f32 %v1056_v18, %v114_v31 }
  0x60   :  { %602 = vst [vmem:[#allocation8 + $0xe0] sm:$0xff] %v474_v60  ;;  %v481_v60 = vadd.f32 %v353_v38, %v952_v33  ;;  %v115_v38 = vld [vmem:[#allocation2 + $0x1a8] sm:$0xff]  ;;  %v365_v45 = vmul.f32 %v1026_v12, %v109_v63  ;;  %v1673_v31 = vld [vmem:[#allocation19_spill] sm:$0xff] }
  0x61   :  { %603 = vst [vmem:[#allocation8 + $0xe8] sm:$0xff] %v475_v22  ;;  %v112_v22 = vld [vmem:[#allocation2 + $0x190] sm:$0xff]  ;;  %v371_v17 = vmul.f32 %v1062_v34, %v115_v38  ;;  %v1674_v38 = vld [vmem:[#allocation41_spill] sm:$0xff] }
  0x62   :  { %604 = vst [vmem:[#allocation8 + $0xf0] sm:$0xff] %v476_v59  ;;  %v361_v59 = vmul.f32 %v1002_v36, %v105_v7  ;;  %v367_v7 = vmul.f32 %v1038_v39, %v111_v5  ;;  %v368_v23 = vmul.f32 %v1044_v53, %v112_v22  ;;  %v118_v36 = vld [vmem:[#allocation2 + $0x1c0] sm:$0xff]  ;;  %v1670_v5 = vld [vmem:[#allocation38_spill] sm:$0xff]  ;;  %v1671_v22 = vld [vmem:[#allocation17_spill] sm:$0xff] }
  0x63   :  { %605 = vst [vmem:[#allocation8 + $0xf8] sm:$0xff] %v477_v62  ;;  %v364_v62 = vmul.f32 %v1020_v2, %v108_v43  ;;  %v488_v43 = vadd.f32 %v360_v49, %v994_v19  ;;  %v373_v63 = vmul.f32 %v1670_v5, %v117_v54  ;;  %v1672_v53 = vld [vmem:[#allocation18_spill] sm:$0xff]  ;;  %v374_v8 = vmul.f32 %v1674_v38, %v118_v36  ;;  %v1675_v49 = vld [vmem:[#allocation21_spill] sm:$0xff] }
  0x64   :  { %606 = vst [vmem:[#allocation8 + $0x100] sm:$0xff] %v478_v57  ;;  %v369_v57 = vmul.f32 %v1050_v3, %v113_v41  ;;  %v489_v32 = vadd.f32 %v361_v59, %v1000_v30  ;;  %v1168_v41 = vadd.f32 %v363_v10, %v1672_v53  ;;  %v1175_v34 = vadd.f32 %v365_v45, %v1675_v49  ;;  %v1676_v59 = vld [vmem:[#allocation23_spill] sm:$0xff]  ;;  %v127_v3 = vld [vmem:[#allocation2 + $0x208] sm:$0xff]  ;;  %v128_v39 = vld [vmem:[#allocation2 + $0x210] sm:$0xff] }
  0x65   :  { %607 = vst [vmem:[#allocation8 + $0x108] sm:$0xff] %v479_v50  ;;  %v487_v50 = vadd.f32 %v359_v28, %v988_v11  ;;  %v1171_v18 = vadd.f32 %v364_v62, %v1673_v31  ;;  %v126_v28 = vld [vmem:[#allocation2 + $0x200] sm:$0xff]  ;;  %v1178_v54 = vadd.f32 %v366_v9, %v1676_v59  ;;  %v1679_v10 = vld [vmem:[#allocation27_spill] sm:$0xff]  ;;  %v1681_v36 = vld [vmem:[#allocation29_spill] sm:$0xff] }
  0x66   :  { %608 = vst [vmem:[#allocation8 + $0x110] sm:$0xff] %v480_v0  ;;  %v490_v0 = vadd.f32 %v362_v35, %v1671_v22  ;;  %v1184_v5 = vadd.f32 %v368_v23, %v1679_v10  ;;  %v121_v62 = vld [vmem:[#allocation2 + $0x1d8] sm:$0xff]  ;;  %v1187_v38 = vadd.f32 %v369_v57, %v1681_v36  ;;  %v1683_v45 = vld [vmem:[#allocation33_spill] sm:$0xff]  ;;  %v130_v23 = vld [vmem:[#allocation2 + $0x220] sm:$0xff] }
  0x67   :  { %609 = vst [vmem:[#allocation8 + $0x118] sm:$0xff] %v481_v60  ;;  %v119_v60 = vld [vmem:[#allocation2 + $0x1c8] sm:$0xff]  ;;  %v1193_v49 = vadd.f32 %v371_v17, %v1683_v45  ;;  %v1685_v9 = vld [vmem:[#allocation35_spill] sm:$0xff] }
  0x68   :  { %610 = vst [vmem:[#allocation8 + $0x120] sm:$0xff] %v482_v29  ;;  %v1677_v29 = vld [vmem:[#allocation25_spill] sm:$0xff]  ;;  %v1196_v59 = vadd.f32 %v372_v14, %v1685_v9  ;;  %v1692_v14 = vld [vmem:[#allocation39_spill] sm:$0xff] }
  0x69   :  { %611 = vst [vmem:[#allocation8 + $0x128] sm:$0xff] %v483_v42  ;;  %v1181_v35 = vadd.f32 %v367_v7, %v1677_v29  ;;  %v1682_v42 = vld [vmem:[#allocation31_spill] sm:$0xff]  ;;  %v122_v7 = vld [vmem:[#allocation2 + $0x1e0] sm:$0xff]  ;;  %v1687_v10 = vld [vmem:[#allocation37_spill] sm:$0xff] }
  0x6a   :  { %1680 = vst [vmem:[#allocation55_spill] sm:$0xff] %v1184_v5  ;;  %v1190_v31 = vadd.f32 %v370_v55, %v1682_v42  ;;  %v129_v29 = vld [vmem:[#allocation2 + $0x218] sm:$0xff]  ;;  %v1199_v5 = vadd.f32 %v373_v63, %v1687_v10  ;;  %v1690_v57 = vld [vmem:[#allocation45_spill] sm:$0xff]  ;;  %v382_v55 = vmul.f32 %v940_v20, %v126_v28  ;;  %v134_v10 = vld [vmem:[#allocation2 + $0x240] sm:$0xff] }
  0x6b   :  { %1678 = vst [vmem:[#allocation17_spill] sm:$0xff] %v1181_v35  ;;  %v1205_v36 = vmul.f32 %v1690_v57, %v120_v48  ;;  %v131_v17 = vld [vmem:[#allocation2 + $0x228] sm:$0xff]  ;;  %v1693_v9 = vld [vmem:[#allocation47_spill] sm:$0xff]  ;;  %v1695_v48 = vld [vmem:[#allocation48_spill] sm:$0xff] }
  0x6c   :  { %612 = vst [vmem:[#allocation8 + $0x130] sm:$0xff] %v484_v13  ;;  %v1689_v13 = vld [vmem:[#allocation43_spill] sm:$0xff]  ;;  %v1212_v45 = vmul.f32 %v1693_v9, %v121_v62  ;;  %v1694_v63 = vld [vmem:[#allocation13_spill] sm:$0xff]  ;;  %v1220_v28 = vadd.f32 %v382_v55, %v938_v16  ;;  %v136_v62 = vld [vmem:[#allocation2 + $0x250] sm:$0xff] }
  0x6d   :  { %1684 = vst [vmem:[#allocation31_spill] sm:$0xff] %v1193_v49  ;;  %v1202_v35 = vmul.f32 %v1689_v13, %v119_v60  ;;  %v132_v49 = vld [vmem:[#allocation2 + $0x230] sm:$0xff]  ;;  %v133_v60 = vld [vmem:[#allocation2 + $0x238] sm:$0xff]  ;;  %v135_v20 = vld [vmem:[#allocation2 + $0x248] sm:$0xff] }
  0x6e   :  { %1686 = vst [vmem:[#allocation56_spill] sm:$0xff] %v1196_v59  ;;  %v1209_v59 = vadd.f32 %v374_v8, %v1692_v14  ;;  %v386_v8 = vmul.f32 %v960_v44, %v130_v23  ;;  %v138_v55 = vld [vmem:[#allocation2 + $0x260] sm:$0xff] }
  0x6f   :  { %613 = vst [vmem:[#allocation8 + $0x138] sm:$0xff] %v485_v52  ;;  %v383_v52 = vmul.f32 %v944_v25, %v127_v3 }
  0x70   :  { %1688 = vst [vmem:[#allocation57_spill] sm:$0xff] %v1199_v5  ;;  %v384_v5 = vmul.f32 %v1694_v63, %v128_v39  ;;  %v137_v63 = vld [vmem:[#allocation2 + $0x258] sm:$0xff]  ;;  %v1236_v23 = vadd.f32 %v386_v8, %v958_v40  ;;  %v142_v8 = vld [vmem:[#allocation2 + $0x280] sm:$0xff] }
  0x71   :  { %1691 = vst [vmem:[#allocation58_spill] sm:$0xff] %v1205_v36  ;;  %v1217_v36 = vmul.f32 %v1695_v48, %v122_v7  ;;  %v1225_v3 = vadd.f32 %v383_v52, %v942_v21  ;;  %v388_v7 = vmul.f32 %v972_v58, %v132_v49  ;;  %v1700_v52 = vld [vmem:[#allocation15_spill] sm:$0xff]  ;;  %v1702_v49 = vld [vmem:[#allocation14_spill] sm:$0xff] }
  0x72   :  { %614 = vst [vmem:[#allocation8 + $0x140] sm:$0xff] %v486_v6  ;;  %v385_v6 = vmul.f32 %v954_v37, %v129_v29  ;;  %v1228_v39 = vadd.f32 %v384_v5, %v947_v27  ;;  %v140_v5 = vld [vmem:[#allocation2 + $0x270] sm:$0xff] }
  0x73   :  { %615 = vst [vmem:[#allocation8 + $0x148] sm:$0xff] %v487_v50  ;;  %v387_v50 = vmul.f32 %v966_v51, %v131_v17 }
  0x74   :  { %1696 = vst [vmem:[#allocation47_spill] sm:$0xff] %v1220_v28  ;;  %v1233_v29 = vadd.f32 %v385_v6, %v952_v33  ;;  %v139_v28 = vld [vmem:[#allocation2 + $0x268] sm:$0xff]  ;;  %v392_v6 = vmul.f32 %v996_v26, %v136_v62 }
  0x75   :  { %616 = vst [vmem:[#allocation8 + $0x150] sm:$0xff] %v488_v43  ;;  %v389_v43 = vmul.f32 %v978_v1, %v133_v60  ;;  %v1241_v17 = vadd.f32 %v387_v50, %v964_v47 }
  0x76   :  { %1697 = vst [vmem:[#allocation59_spill] sm:$0xff] %v1225_v3  ;;  %v390_v3 = vmul.f32 %v1700_v52, %v134_v10  ;;  %v1262_v62 = vadd.f32 %v392_v6, %v994_v19  ;;  %v147_v6 = vld [vmem:[#allocation2 + $0x2a8] sm:$0xff] }
  0x77   :  { %1698 = vst [vmem:[#allocation60_spill] sm:$0xff] %v1228_v39  ;;  %v1244_v39 = vadd.f32 %v388_v7, %v1702_v49  ;;  %v1250_v60 = vadd.f32 %v389_v43, %v976_v61  ;;  %v143_v7 = vld [vmem:[#allocation2 + $0x288] sm:$0xff]  ;;  %v396_v43 = vmul.f32 %v1020_v2, %v140_v5  ;;  %v1711_v5 = vld [vmem:[#allocation19_spill] sm:$0xff] }
  0x78   :  { %617 = vst [vmem:[#allocation8 + $0x158] sm:$0xff] %v489_v32  ;;  %v391_v32 = vmul.f32 %v990_v15, %v135_v20  ;;  %v1253_v10 = vadd.f32 %v390_v3, %v982_v4  ;;  %v145_v3 = vld [vmem:[#allocation2 + $0x298] sm:$0xff] }
  0x79   :  { %1699 = vst [vmem:[#allocation61_spill] sm:$0xff] %v1233_v29  ;;  %v141_v29 = vld [vmem:[#allocation2 + $0x278] sm:$0xff] }
  0x7a   :  { %618 = vst [vmem:[#allocation8 + $0x160] sm:$0xff] %v490_v0  ;;  %v1705_v0 = vld [vmem:[#allocation16_spill] sm:$0xff]  ;;  %v1259_v20 = vadd.f32 %v391_v32, %v988_v11  ;;  %v398_v32 = vmul.f32 %v1032_v24, %v142_v8  ;;  %v1718_v8 = vld [vmem:[#allocation23_spill] sm:$0xff] }
  0x7b   :  { %1701 = vst [vmem:[#allocation15_spill] sm:$0xff] %v1241_v17  ;;  %v393_v50 = vmul.f32 %v1705_v0, %v137_v63  ;;  %v394_v17 = vmul.f32 %v1008_v46, %v138_v55 }
  0x7c   :  { %1703 = vst [vmem:[#allocation14_spill] sm:$0xff] %v1244_v39  ;;  %v144_v39 = vld [vmem:[#allocation2 + $0x290] sm:$0xff]  ;;  %v1289_v24 = vadd.f32 %v398_v32, %v1718_v8  ;;  %v150_v32 = vld [vmem:[#allocation2 + $0x2c0] sm:$0xff] }
  0x7d   :  { %619 = vst [vmem:[#allocation8 + $0x168] sm:$0xff] %v1168_v41  ;;  %v395_v41 = vmul.f32 %v1014_v56, %v139_v28  ;;  %v1268_v63 = vadd.f32 %v393_v50, %v1000_v30  ;;  %v1271_v55 = vadd.f32 %v394_v17, %v1671_v22  ;;  %v1714_v50 = vld [vmem:[#allocation28_spill] sm:$0xff]  ;;  %v1715_v17 = vld [vmem:[#allocation17_spill] sm:$0xff] }
  0x7e   :  { %1704 = vst [vmem:[#allocation62_spill] sm:$0xff] %v1253_v10  ;;  %v146_v10 = vld [vmem:[#allocation2 + $0x2a0] sm:$0xff] }
  0x7f   :  { %620 = vst [vmem:[#allocation8 + $0x170] sm:$0xff] %v1171_v18  ;;  %v397_v18 = vmul.f32 %v1026_v12, %v141_v29  ;;  %v1277_v28 = vadd.f32 %v395_v41, %v1672_v53  ;;  %v1721_v41 = vld [vmem:[#allocation32_spill] sm:$0xff]  ;;  %v149_v53 = vld [vmem:[#allocation2 + $0x2b8] sm:$0xff] }
  0x80   :  { %1706 = vst [vmem:[#allocation16_spill] sm:$0xff] %v1259_v20  ;;  %v148_v20 = vld [vmem:[#allocation2 + $0x2b0] sm:$0xff] }
  0x81   :  { %1707 = vst [vmem:[#allocation63_spill] sm:$0xff] %v1262_v62  ;;  %v1280_v62 = vadd.f32 %v396_v43, %v1711_v5  ;;  %v1722_v43 = vld [vmem:[#allocation55_spill] sm:$0xff] }
  0x82   :  { %621 = vst [vmem:[#allocation8 + $0x178] sm:$0xff] %v1175_v34  ;;  %v1713_v34 = vld [vmem:[#allocation26_spill] sm:$0xff] }
  0x83   :  { %1708 = vst [vmem:[#allocation64_spill] sm:$0xff] %v1268_v63  ;;  %v399_v2 = vmul.f32 %v1713_v34, %v143_v7  ;;  %v400_v63 = vmul.f32 %v1714_v50, %v144_v39  ;;  %v1723_v7 = vld [vmem:[#allocation25_spill] sm:$0xff]  ;;  %v1725_v39 = vld [vmem:[#allocation27_spill] sm:$0xff] }
  0x84   :  { %1709 = vst [vmem:[#allocation65_spill] sm:$0xff] %v1271_v55  ;;  %v1716_v55 = vld [vmem:[#allocation21_spill] sm:$0xff] }
  0x85   :  { %622 = vst [vmem:[#allocation8 + $0x180] sm:$0xff] %v1178_v54  ;;  %v1286_v29 = vadd.f32 %v397_v18, %v1716_v55  ;;  %v1720_v54 = vld [vmem:[#allocation30_spill] sm:$0xff]  ;;  %v1295_v34 = vadd.f32 %v399_v2, %v1723_v7  ;;  %v1298_v50 = vadd.f32 %v400_v63, %v1725_v39  ;;  %v151_v63 = vld [vmem:[#allocation2 + $0x2c8] sm:$0xff] }
  0x86   :  { %1710 = vst [vmem:[#allocation66_spill] sm:$0xff] %v1277_v28  ;;  %v401_v12 = vmul.f32 %v1720_v54, %v145_v3  ;;  %v402_v28 = vmul.f32 %v1721_v41, %v146_v10  ;;  %v124_v3 = vld [vmem:[#allocation2 + $0x1f0] sm:$0xff] }
  0x87   :  { %1712 = vst [vmem:[#allocation19_spill] sm:$0xff] %v1280_v62  ;;  %v123_v62 = vld [vmem:[#allocation2 + $0x1e8] sm:$0xff]  ;;  %v1732_v41 = vld [vmem:[#allocation38_spill] sm:$0xff] }
  0x88   :  { %623 = vst [vmem:[#allocation8 + $0x188] sm:$0xff] %v1715_v17  ;;  %v1727_v17 = vld [vmem:[#allocation34_spill] sm:$0xff]  ;;  %v405_v2 = vmul.f32 %v1732_v41, %v149_v53  ;;  %v1740_v53 = vld [vmem:[#allocation49_spill] sm:$0xff] }
  0x89   :  { %1717 = vst [vmem:[#allocation17_spill] sm:$0xff] %v1286_v29  ;;  %v403_v18 = vmul.f32 %v1727_v17, %v147_v6  ;;  %v1728_v29 = vld [vmem:[#allocation36_spill] sm:$0xff]  ;;  %v1737_v17 = vld [vmem:[#allocation35_spill] sm:$0xff] }
  0x8a   :  { %1719 = vst [vmem:[#allocation23_spill] sm:$0xff] %v1289_v24  ;;  %v404_v55 = vmul.f32 %v1728_v29, %v148_v20  ;;  %v1729_v24 = vld [vmem:[#allocation29_spill] sm:$0xff]  ;;  %v1734_v6 = vld [vmem:[#allocation40_spill] sm:$0xff] }
  0x8b   :  { %624 = vst [vmem:[#allocation8 + $0x190] sm:$0xff] %v1722_v43  ;;  %v1304_v10 = vadd.f32 %v401_v12, %v1729_v24  ;;  %v1307_v43 = vadd.f32 %v402_v28, %v1682_v42  ;;  %v503_v20 = vadd.f32 %v1202_v35, %v1734_v6  ;;  %v1735_v29 = vld [vmem:[#allocation33_spill] sm:$0xff]  ;;  %v407_v28 = vmul.f32 %v1689_v13, %v151_v63  ;;  %v1747_v63 = vld [vmem:[#allocation51_spill] sm:$0xff] }
  0x8c   :  { %1724 = vst [vmem:[#allocation55_spill] sm:$0xff] %v1295_v34  ;;  %v1733_v34 = vld [vmem:[#allocation41_spill] sm:$0xff]  ;;  %v1318_v12 = vadd.f32 %v404_v55, %v1737_v17  ;;  %v1745_v55 = vld [vmem:[#allocation42_spill] sm:$0xff]  ;;  %v380_v13 = vmul.f32 %v1747_v63, %v124_v3 }
  0x8d   :  { %1726 = vst [vmem:[#allocation25_spill] sm:$0xff] %v1298_v50  ;;  %v406_v54 = vmul.f32 %v1733_v34, %v150_v32  ;;  %v125_v50 = vld [vmem:[#allocation2 + $0x1f8] sm:$0xff]  ;;  %v379_v32 = vmul.f32 %v1740_v53, %v123_v62  ;;  %v1741_v34 = vld [vmem:[#allocation37_spill] sm:$0xff]  ;;  %v1753_v3 = vld [vmem:[#allocation46_spill] sm:$0xff] }
  0x8e   :  { %625 = vst [vmem:[#allocation8 + $0x198] sm:$0xff] %v1187_v38  ;;  %v1315_v38 = vadd.f32 %v403_v18, %v1735_v29  ;;  %v1324_v41 = vadd.f32 %v405_v2, %v1741_v34  ;;  %v153_v18 = vld [vmem:[#allocation2 + $0x2d8] sm:$0xff]  ;;  %v154_v2 = vld [vmem:[#allocation2 + $0x2e0] sm:$0xff] }
  0x8f   :  { %1730 = vst [vmem:[#allocation27_spill] sm:$0xff] %v1304_v10  ;;  %v1739_v10 = vld [vmem:[#allocation31_spill] sm:$0xff]  ;;  %v409_v62 = vmul.f32 %v1693_v9, %v153_v18 }
  0x90   :  { %1731 = vst [vmem:[#allocation29_spill] sm:$0xff] %v1307_v43  ;;  %v152_v43 = vld [vmem:[#allocation2 + $0x2d0] sm:$0xff] }
  0x91   :  { %626 = vst [vmem:[#allocation8 + $0x1a0] sm:$0xff] %v1190_v31  ;;  %v1327_v31 = vadd.f32 %v406_v54, %v1692_v14  ;;  %v408_v35 = vmul.f32 %v1690_v57, %v152_v43  ;;  %v1750_v54 = vld [vmem:[#allocation44_spill] sm:$0xff]  ;;  %v1751_v43 = vld [vmem:[#allocation53_spill] sm:$0xff] }
  0x92   :  { %1736 = vst [vmem:[#allocation40_spill] sm:$0xff] %v1315_v38  ;;  %v1744_v38 = vld [vmem:[#allocation56_spill] sm:$0xff]  ;;  %v381_v57 = vmul.f32 %v1751_v43, %v125_v50  ;;  %v155_v14 = vld [vmem:[#allocation2 + $0x2e8] sm:$0xff]  ;;  %v1350_v18 = vadd.f32 %v409_v62, %v1750_v54 }
  0x93   :  { %1738 = vst [vmem:[#allocation33_spill] sm:$0xff] %v1318_v12  ;;  %v1746_v12 = vld [vmem:[#allocation58_spill] sm:$0xff] }
  0x94   :  { %627 = vst [vmem:[#allocation8 + $0x1a8] sm:$0xff] %v1739_v10  ;;  %v504_v17 = vadd.f32 %v1746_v12, %v1745_v55  ;;  %v1335_v10 = vadd.f32 %v407_v28, %v1734_v6  ;;  %v410_v12 = vmul.f32 %v1695_v48, %v154_v2  ;;  %v506_v28 = vadd.f32 %v1217_v36, %v1753_v3 }
  0x95   :  { %1742 = vst [vmem:[#allocation31_spill] sm:$0xff] %v1324_v41  ;;  %v1749_v41 = vld [vmem:[#allocation57_spill] sm:$0xff] }
  0x96   :  { %1743 = vst [vmem:[#allocation49_spill] sm:$0xff] %v1327_v31  ;;  %v505_v31 = vadd.f32 %v1212_v45, %v1750_v54  ;;  %v1755_v45 = vld [vmem:[#allocation50_spill] sm:$0xff] }
  0x97   :  { %628 = vst [vmem:[#allocation8 + $0x1b0] sm:$0xff] %v1744_v38  ;;  %v1343_v38 = vadd.f32 %v408_v35, %v1745_v55  ;;  %v507_v50 = vadd.f32 %v379_v32, %v1755_v45  ;;  %v1355_v35 = vadd.f32 %v410_v12, %v1753_v3  ;;  %v1759_v12 = vld [vmem:[#allocation12_spill] sm:$0xff]  ;;  %v159_v3 = vld [vmem:[#allocation2 + $0x308] sm:$0xff] }
  0x98   :  { %1748 = vst [vmem:[#allocation37_spill] sm:$0xff] %v1335_v10  ;;  %v156_v10 = vld [vmem:[#allocation2 + $0x2f0] sm:$0xff] }
  0x99   :  { %629 = vst [vmem:[#allocation8 + $0x1b8] sm:$0xff] %v1749_v41  ;;  %v411_v41 = vmul.f32 %v1740_v53, %v155_v14  ;;  %v412_v2 = vmul.f32 %v1747_v63, %v156_v10  ;;  %v1758_v14 = vld [vmem:[#allocation54_spill] sm:$0xff] }
  0x9a   :  { %1752 = vst [vmem:[#allocation56_spill] sm:$0xff] %v1343_v38  ;;  %v157_v38 = vld [vmem:[#allocation2 + $0x2f8] sm:$0xff]  ;;  %v160_v10 = vld [vmem:[#allocation2 + $0x310] sm:$0xff] }
  0x9b   :  { %630 = vst [vmem:[#allocation8 + $0x1c0] sm:$0xff] %v1209_v59  ;;  %v1757_v59 = vld [vmem:[#allocation52_spill] sm:$0xff]  ;;  %v1360_v36 = vadd.f32 %v411_v41, %v1755_v45  ;;  %v413_v62 = vmul.f32 %v1751_v43, %v157_v38 }
  0x9c   :  { %1754 = vst [vmem:[#allocation42_spill] sm:$0xff] %v1350_v18  ;;  %v508_v48 = vadd.f32 %v380_v13, %v1757_v59  ;;  %v158_v18 = vld [vmem:[#allocation2 + $0x300] sm:$0xff]  ;;  %v1365_v32 = vadd.f32 %v412_v2, %v1757_v59  ;;  %v415_v13 = vmul.f32 %v944_v25, %v159_v3  ;;  %v163_v3 = vld [vmem:[#allocation2 + $0x328] sm:$0xff] }
  0x9d   :  { %631 = vst [vmem:[#allocation8 + $0x1c8] sm:$0xff] %v503_v20  ;;  %v509_v20 = vadd.f32 %v381_v57, %v1758_v14  ;;  %v161_v57 = vld [vmem:[#allocation2 + $0x318] sm:$0xff] }
  0x9e   :  { %1756 = vst [vmem:[#allocation58_spill] sm:$0xff] %v1355_v35  ;;  %v414_v35 = vmul.f32 %v1759_v12, %v158_v18  ;;  %v1377_v2 = vadd.f32 %v415_v13, %v942_v21  ;;  %v417_v18 = vmul.f32 %v954_v37, %v161_v57  ;;  %v1762_v21 = vld [vmem:[#allocation59_spill] sm:$0xff]  ;;  %v1763_v12 = vld [vmem:[#allocation60_spill] sm:$0xff] }
  0x9f   :  { %632 = vst [vmem:[#allocation8 + $0x1d0] sm:$0xff] %v504_v17  ;;  %v1369_v17 = vadd.f32 %v413_v62, %v1758_v14  ;;  %v1765_v57 = vld [vmem:[#allocation15_spill] sm:$0xff] }
  0xa0   :  { %633 = vst [vmem:[#allocation8 + $0x1d8] sm:$0xff] %v505_v31  ;;  %v1373_v38 = vadd.f32 %v414_v35, %v938_v16  ;;  %v1760_v31 = vld [vmem:[#allocation13_spill] sm:$0xff]  ;;  %v1386_v16 = vadd.f32 %v417_v18, %v952_v33  ;;  %v164_v35 = vld [vmem:[#allocation2 + $0x330] sm:$0xff]  ;;  %v166_v33 = vld [vmem:[#allocation2 + $0x340] sm:$0xff] }
  0xa1   :  { %634 = vst [vmem:[#allocation8 + $0x1e0] sm:$0xff] %v506_v28  ;;  %v416_v41 = vmul.f32 %v1760_v31, %v160_v10  ;;  %v162_v28 = vld [vmem:[#allocation2 + $0x320] sm:$0xff]  ;;  %v1764_v10 = vld [vmem:[#allocation61_spill] sm:$0xff]  ;;  %v422_v31 = vmul.f32 %v1700_v52, %v166_v33 }
  0xa2   :  { %635 = vst [vmem:[#allocation8 + $0x1e8] sm:$0xff] %v507_v50  ;;  %v418_v25 = vmul.f32 %v960_v44, %v162_v28  ;;  %v1761_v50 = vld [vmem:[#allocation47_spill] sm:$0xff]  ;;  %v1766_v28 = vld [vmem:[#allocation14_spill] sm:$0xff]  ;;  %v1774_v33 = vld [vmem:[#allocation24_spill] sm:$0xff] }
  0xa3   :  { %636 = vst [vmem:[#allocation8 + $0x1f0] sm:$0xff] %v508_v48  ;;  %v1381_v62 = vadd.f32 %v416_v41, %v947_v27  ;;  %v419_v48 = vmul.f32 %v966_v51, %v163_v3  ;;  %v165_v27 = vld [vmem:[#allocation2 + $0x338] sm:$0xff]  ;;  %v1767_v3 = vld [vmem:[#allocation62_spill] sm:$0xff] }
  0xa4   :  { %637 = vst [vmem:[#allocation8 + $0x1f8] sm:$0xff] %v509_v20  ;;  %v1391_v37 = vadd.f32 %v418_v25, %v958_v40  ;;  %v420_v20 = vmul.f32 %v972_v58, %v164_v35  ;;  %v421_v13 = vmul.f32 %v978_v1, %v165_v27  ;;  %v167_v40 = vld [vmem:[#allocation2 + $0x348] sm:$0xff]  ;;  %v1411_v1 = vadd.f32 %v422_v31, %v982_v4  ;;  %v1772_v27 = vld [vmem:[#allocation22_spill] sm:$0xff] }
  0xa5   :  { %638 = vst [vmem:[#allocation8 + $0x200] sm:$0xff] %v1761_v50  ;;  %v1396_v44 = vadd.f32 %v419_v48, %v964_v47  ;;  %v423_v41 = vmul.f32 %v990_v15, %v167_v40  ;;  %v168_v47 = vld [vmem:[#allocation2 + $0x350] sm:$0xff]  ;;  %v171_v4 = vld [vmem:[#allocation2 + $0x368] sm:$0xff]  ;;  %v1768_v48 = vld [vmem:[#allocation16_spill] sm:$0xff] }
  0xa6   :  { %639 = vst [vmem:[#allocation8 + $0x208] sm:$0xff] %v1762_v21  ;;  %v1401_v51 = vadd.f32 %v420_v20, %v1702_v49  ;;  %v1406_v58 = vadd.f32 %v421_v13, %v976_v61  ;;  %v424_v18 = vmul.f32 %v996_v26, %v168_v47  ;;  %v169_v49 = vld [vmem:[#allocation2 + $0x358] sm:$0xff]  ;;  %v170_v61 = vld [vmem:[#allocation2 + $0x360] sm:$0xff]  ;;  %v427_v50 = vmul.f32 %v1014_v56, %v171_v4  ;;  %v1775_v31 = vld [vmem:[#allocation65_spill] sm:$0xff] }
  0xa7   :  { %640 = vst [vmem:[#allocation8 + $0x210] sm:$0xff] %v1763_v12  ;;  %v1416_v52 = vadd.f32 %v423_v41, %v988_v11  ;;  %v426_v25 = vmul.f32 %v1008_v46, %v170_v61  ;;  %v172_v11 = vld [vmem:[#allocation2 + $0x370] sm:$0xff]  ;;  %v1770_v21 = vld [vmem:[#allocation63_spill] sm:$0xff]  ;;  %v1773_v13 = vld [vmem:[#allocation64_spill] sm:$0xff] }
  0xa8   :  { %641 = vst [vmem:[#allocation8 + $0x218] sm:$0xff] %v1764_v10  ;;  %v1421_v15 = vadd.f32 %v424_v18, %v994_v19  ;;  %v173_v19 = vld [vmem:[#allocation2 + $0x378] sm:$0xff]  ;;  %v1771_v46 = vld [vmem:[#allocation18_spill] sm:$0xff]  ;;  %v1776_v40 = vld [vmem:[#allocation21_spill] sm:$0xff] }
  0xa9   :  { %642 = vst [vmem:[#allocation8 + $0x220] sm:$0xff] %v1236_v23  ;;  %v425_v23 = vmul.f32 %v1705_v0, %v169_v49  ;;  %v1431_v0 = vadd.f32 %v426_v25, %v1671_v22  ;;  %v1436_v20 = vadd.f32 %v427_v50, %v1771_v46  ;;  %v429_v12 = vmul.f32 %v1772_v27, %v173_v19  ;;  %v175_v22 = vld [vmem:[#allocation2 + $0x388] sm:$0xff]  ;;  %v1777_v47 = vld [vmem:[#allocation26_spill] sm:$0xff]  ;;  %v1780_v25 = vld [vmem:[#allocation19_spill] sm:$0xff] }
  0xaa   :  { %643 = vst [vmem:[#allocation8 + $0x228] sm:$0xff] %v1765_v57  ;;  %v431_v57 = vmul.f32 %v1777_v47, %v175_v22  ;;  %v176_v18 = vld [vmem:[#allocation2 + $0x390] sm:$0xff]  ;;  %v1788_v22 = vld [vmem:[#allocation25_spill] sm:$0xff] }
  0xab   :  { %644 = vst [vmem:[#allocation8 + $0x230] sm:$0xff] %v1766_v28  ;;  %v1426_v26 = vadd.f32 %v425_v23, %v1000_v30  ;;  %v174_v30 = vld [vmem:[#allocation2 + $0x380] sm:$0xff]  ;;  %v1446_v41 = vadd.f32 %v429_v12, %v1776_v40  ;;  %v1778_v49 = vld [vmem:[#allocation66_spill] sm:$0xff] }
  0xac   :  { %645 = vst [vmem:[#allocation8 + $0x238] sm:$0xff] %v1250_v60  ;;  %v1769_v60 = vld [vmem:[#allocation20_spill] sm:$0xff]  ;;  %v430_v10 = vmul.f32 %v1774_v33, %v174_v30  ;;  %v1456_v4 = vadd.f32 %v431_v57, %v1723_v7  ;;  %v1785_v27 = vld [vmem:[#allocation34_spill] sm:$0xff]  ;;  %v1786_v30 = vld [vmem:[#allocation55_spill] sm:$0xff] }
  0xad   :  { %646 = vst [vmem:[#allocation8 + $0x240] sm:$0xff] %v1767_v3  ;;  %v428_v35 = vmul.f32 %v1769_v60, %v172_v11  ;;  %v1779_v23 = vld [vmem:[#allocation28_spill] sm:$0xff]  ;;  %v1781_v3 = vld [vmem:[#allocation30_spill] sm:$0xff] }
  0xae   :  { %647 = vst [vmem:[#allocation8 + $0x248] sm:$0xff] %v1768_v48  ;;  %v1451_v28 = vadd.f32 %v430_v10, %v1718_v8  ;;  %v432_v61 = vmul.f32 %v1779_v23, %v176_v18  ;;  %v178_v11 = vld [vmem:[#allocation2 + $0x3a0] sm:$0xff]  ;;  %v1782_v48 = vld [vmem:[#allocation17_spill] sm:$0xff]  ;;  %v180_v7 = vld [vmem:[#allocation2 + $0x3b0] sm:$0xff] }
  0xaf   :  { %648 = vst [vmem:[#allocation8 + $0x250] sm:$0xff] %v1770_v21  ;;  %v1441_v56 = vadd.f32 %v428_v35, %v1711_v5  ;;  %v177_v5 = vld [vmem:[#allocation2 + $0x398] sm:$0xff]  ;;  %v1783_v35 = vld [vmem:[#allocation32_spill] sm:$0xff]  ;;  %v179_v8 = vld [vmem:[#allocation2 + $0x3a8] sm:$0xff] }
  0xb0   :  { %649 = vst [vmem:[#allocation8 + $0x258] sm:$0xff] %v1773_v13  ;;  %v433_v50 = vmul.f32 %v1781_v3, %v177_v5  ;;  %v1461_v60 = vadd.f32 %v432_v61, %v1725_v39  ;;  %v434_v19 = vmul.f32 %v1783_v35, %v178_v11  ;;  %v1784_v21 = vld [vmem:[#allocation23_spill] sm:$0xff]  ;;  %v435_v12 = vmul.f32 %v1785_v27, %v179_v8  ;;  %v1787_v33 = vld [vmem:[#allocation36_spill] sm:$0xff]  ;;  %v1789_v40 = vld [vmem:[#allocation38_spill] sm:$0xff] }
  0xb1   :  { %650 = vst [vmem:[#allocation8 + $0x260] sm:$0xff] %v1775_v31  ;;  %v436_v10 = vmul.f32 %v1787_v33, %v180_v7  ;;  %v181_v39 = vld [vmem:[#allocation2 + $0x3b8] sm:$0xff]  ;;  %v182_v57 = vld [vmem:[#allocation2 + $0x3c0] sm:$0xff]  ;;  %v1792_v23 = vld [vmem:[#allocation41_spill] sm:$0xff] }
  0xb2   :  { %651 = vst [vmem:[#allocation8 + $0x268] sm:$0xff] %v1778_v49  ;;  %v1466_v46 = vadd.f32 %v433_v50, %v1729_v24  ;;  %v1471_v13 = vadd.f32 %v434_v19, %v1682_v42  ;;  %v563_v31 = vadd.f32 %v435_v12, %v1735_v29  ;;  %v437_v47 = vmul.f32 %v1789_v40, %v181_v39  ;;  %v1790_v24 = vld [vmem:[#allocation27_spill] sm:$0xff]  ;;  %v183_v5 = vld [vmem:[#allocation2 + $0x3c8] sm:$0xff]  ;;  %v184_v11 = vld [vmem:[#allocation2 + $0x3d0] sm:$0xff] }
  0xb3   :  { %652 = vst [vmem:[#allocation8 + $0x270] sm:$0xff] %v1780_v25  ;;  %v1791_v18 = vld [vmem:[#allocation35_spill] sm:$0xff]  ;;  %v438_v61 = vmul.f32 %v1792_v23, %v182_v57  ;;  %v1793_v25 = vld [vmem:[#allocation29_spill] sm:$0xff] }
  0xb4   :  { %653 = vst [vmem:[#allocation8 + $0x278] sm:$0xff] %v1782_v48  ;;  %v564_v49 = vadd.f32 %v436_v10, %v1791_v18  ;;  %v565_v42 = vadd.f32 %v437_v47, %v1741_v34  ;;  %v1794_v3 = vld [vmem:[#allocation43_spill] sm:$0xff]  ;;  %v1795_v48 = vld [vmem:[#allocation40_spill] sm:$0xff]  ;;  %v1797_v19 = vld [vmem:[#allocation45_spill] sm:$0xff] }
  0xb5   :  { %654 = vst [vmem:[#allocation8 + $0x280] sm:$0xff] %v1784_v21  ;;  %v439_v50 = vmul.f32 %v1794_v3, %v183_v5  ;;  %v1796_v29 = vld [vmem:[#allocation39_spill] sm:$0xff]  ;;  %v440_v8 = vmul.f32 %v1797_v19, %v184_v11  ;;  %v1798_v27 = vld [vmem:[#allocation33_spill] sm:$0xff]  ;;  %v1800_v10 = vld [vmem:[#allocation48_spill] sm:$0xff] }
  0xb6   :  { %655 = vst [vmem:[#allocation8 + $0x288] sm:$0xff] %v1786_v30  ;;  %v566_v35 = vadd.f32 %v438_v61, %v1796_v29  ;;  %v185_v21 = vld [vmem:[#allocation2 + $0x3d8] sm:$0xff]  ;;  %v186_v30 = vld [vmem:[#allocation2 + $0x3e0] sm:$0xff]  ;;  %v1801_v40 = vld [vmem:[#allocation49_spill] sm:$0xff] }
  0xb7   :  { %656 = vst [vmem:[#allocation8 + $0x290] sm:$0xff] %v1788_v22  ;;  %v567_v12 = vadd.f32 %v439_v50, %v1734_v6  ;;  %v441_v7 = vmul.f32 %v1693_v9, %v185_v21  ;;  %v1799_v33 = vld [vmem:[#allocation31_spill] sm:$0xff]  ;;  %v568_v34 = vadd.f32 %v440_v8, %v1745_v55  ;;  %v442_v39 = vmul.f32 %v1800_v10, %v186_v30  ;;  %v187_v22 = vld [vmem:[#allocation2 + $0x3e8] sm:$0xff]  ;;  %v1803_v6 = vld [vmem:[#allocation46_spill] sm:$0xff] }
  0xb8   :  { %657 = vst [vmem:[#allocation8 + $0x298] sm:$0xff] %v1790_v24  ;;  %v443_v57 = vmul.f32 %v1740_v53, %v187_v22  ;;  %v188_v24 = vld [vmem:[#allocation2 + $0x3f0] sm:$0xff]  ;;  %v1802_v18 = vld [vmem:[#allocation37_spill] sm:$0xff]  ;;  %v189_v61 = vld [vmem:[#allocation2 + $0x3f8] sm:$0xff] }
  0xb9   :  { %658 = vst [vmem:[#allocation8 + $0x2a0] sm:$0xff] %v1793_v25  ;;  %v569_v47 = vadd.f32 %v441_v7, %v1750_v54  ;;  %v570_v23 = vadd.f32 %v442_v39, %v1803_v6  ;;  %v444_v9 = vmul.f32 %v1747_v63, %v188_v24  ;;  %v1804_v5 = vld [vmem:[#allocation56_spill] sm:$0xff]  ;;  %v445_v25 = vmul.f32 %v1751_v43, %v189_v61  ;;  %v1805_v3 = vld [vmem:[#allocation42_spill] sm:$0xff] }
  0xba   :  { %659 = vst [vmem:[#allocation8 + $0x2a8] sm:$0xff] %v1795_v48  ;;  %v571_v55 = vadd.f32 %v443_v57, %v1755_v45  ;;  %v1806_v50 = vld [vmem:[#allocation58_spill] sm:$0xff] }
  0xbb   :  { %660 = vst [vmem:[#allocation8 + $0x2b0] sm:$0xff] %v1798_v27  ;;  %v572_v54 = vadd.f32 %v444_v9, %v1757_v59  ;;  %v573_v53 = vadd.f32 %v445_v25, %v1758_v14 }
  0xbc   :  { %661 = vst [vmem:[#allocation8 + $0x2b8] sm:$0xff] %v1799_v33 }
  0xbd   :  { %662 = vst [vmem:[#allocation8 + $0x2c0] sm:$0xff] %v1801_v40 }
  0xbe   :  { %663 = vst [vmem:[#allocation8 + $0x2c8] sm:$0xff] %v1802_v18 }
  0xbf   :  { %664 = vst [vmem:[#allocation8 + $0x2d0] sm:$0xff] %v1804_v5 }
  0xc0   :  { %665 = vst [vmem:[#allocation8 + $0x2d8] sm:$0xff] %v1805_v3 }
  0xc1   :  { %666 = vst [vmem:[#allocation8 + $0x2e0] sm:$0xff] %v1806_v50 }
  0xc2   :  { %667 = vst [vmem:[#allocation8 + $0x2e8] sm:$0xff] %v1360_v36 }
  0xc3   :  { %668 = vst [vmem:[#allocation8 + $0x2f0] sm:$0xff] %v1365_v32 }
  0xc4   :  { %669 = vst [vmem:[#allocation8 + $0x2f8] sm:$0xff] %v1369_v17 }
  0xc5   :  { %670 = vst [vmem:[#allocation8 + $0x300] sm:$0xff] %v1373_v38 }
  0xc6   :  { %671 = vst [vmem:[#allocation8 + $0x308] sm:$0xff] %v1377_v2 }
  0xc7   :  { %672 = vst [vmem:[#allocation8 + $0x310] sm:$0xff] %v1381_v62 }
  0xc8   :  { %673 = vst [vmem:[#allocation8 + $0x318] sm:$0xff] %v1386_v16 }
  0xc9   :  { %674 = vst [vmem:[#allocation8 + $0x320] sm:$0xff] %v1391_v37 }
  0xca   :  { %675 = vst [vmem:[#allocation8 + $0x328] sm:$0xff] %v1396_v44 }
  0xcb   :  { %676 = vst [vmem:[#allocation8 + $0x330] sm:$0xff] %v1401_v51 }
  0xcc   :  { %677 = vst [vmem:[#allocation8 + $0x338] sm:$0xff] %v1406_v58 }
  0xcd   :  { %678 = vst [vmem:[#allocation8 + $0x340] sm:$0xff] %v1411_v1 }
  0xce   :  { %679 = vst [vmem:[#allocation8 + $0x348] sm:$0xff] %v1416_v52 }
  0xcf   :  { %680 = vst [vmem:[#allocation8 + $0x350] sm:$0xff] %v1421_v15 }
  0xd0   :  { %681 = vst [vmem:[#allocation8 + $0x358] sm:$0xff] %v1426_v26 }
  0xd1   :  { %682 = vst [vmem:[#allocation8 + $0x360] sm:$0xff] %v1431_v0 }
  0xd2   :  { %683 = vst [vmem:[#allocation8 + $0x368] sm:$0xff] %v1436_v20 }
  0xd3   :  { %684 = vst [vmem:[#allocation8 + $0x370] sm:$0xff] %v1441_v56 }
  0xd4   :  { %685 = vst [vmem:[#allocation8 + $0x378] sm:$0xff] %v1446_v41 }
  0xd5   :  { %686 = vst [vmem:[#allocation8 + $0x380] sm:$0xff] %v1451_v28 }
  0xd6   :  { %687 = vst [vmem:[#allocation8 + $0x388] sm:$0xff] %v1456_v4 }
  0xd7   :  { %688 = vst [vmem:[#allocation8 + $0x390] sm:$0xff] %v1461_v60 }
  0xd8   :  { %689 = vst [vmem:[#allocation8 + $0x398] sm:$0xff] %v1466_v46 }
  0xd9   :  { %690 = vst [vmem:[#allocation8 + $0x3a0] sm:$0xff] %v1471_v13 }
  0xda   :  { %691 = vst [vmem:[#allocation8 + $0x3a8] sm:$0xff] %v563_v31 }
  0xdb   :  { %692 = vst [vmem:[#allocation8 + $0x3b0] sm:$0xff] %v564_v49 }
  0xdc   :  { %693 = vst [vmem:[#allocation8 + $0x3b8] sm:$0xff] %v565_v42 }
  0xdd   :  { %694 = vst [vmem:[#allocation8 + $0x3c0] sm:$0xff] %v566_v35 }
  0xde   :  { %695 = vst [vmem:[#allocation8 + $0x3c8] sm:$0xff] %v567_v12 }
  0xdf   :  { %696 = vst [vmem:[#allocation8 + $0x3d0] sm:$0xff] %v568_v34 }
  0xe0   :  { %697 = vst [vmem:[#allocation8 + $0x3d8] sm:$0xff] %v569_v47 }
  0xe1   :  { %698 = vst [vmem:[#allocation8 + $0x3e0] sm:$0xff] %v570_v23 }
  0xe2   :  { %699 = vst [vmem:[#allocation8 + $0x3e8] sm:$0xff] %v571_v55 }
  0xe3   :  { %700 = vst [vmem:[#allocation8 + $0x3f0] sm:$0xff] %v572_v54 }
  0xe4   :  { %701 = vst [vmem:[#allocation8 + $0x3f8] sm:$0xff] %v573_v53 }
  0xe5   :  { %714 = dma.vmem_to_hbm [thread:$0]  %s707_s27, 16384, %s709_s30, [#allocation4], %s895_s20, %s895_s20, %s896_s21  }
  0xe6   :  { %892 = dma.done.wait [#allocation4], 16384  }
  0xe7   :  { %893 = vsyncadd [#allocation4], 4294950912 }
  0xe8   :  { %719 = vsyncpa [#allocation3], 1 }
  0xe9   :  { %720 = vsyncpa [#allocation6], 1 }
  0xea   :  { %721 = vsyncpa [#allocation4], 1 }

</bundles_post_ra>
